<compile_context>
chip_gen: v7x
topology: tpu7x:2x2x1
jax: 0.10.0
libtpu: 0.0.40
codegen_flags: <defaults>
</compile_context>

<pallas_src>
import functools

import jax
import jax.numpy as jnp
from jax.experimental import pallas as pl
from jax.experimental.pallas import tpu as pltpu


def _abs_pow(x, p):
    """|x|^p. Integer p via repeated multiply; even p skips the abs entirely."""
    pf = float(p)
    if pf.is_integer() and pf >= 1:
        pi = int(pf)
        base = x if (pi % 2 == 0) else jnp.abs(x)
        r = base
        for _ in range(pi - 1):
            r = r * base
        return r
    return jnp.power(jnp.abs(x), pf)


def _rgd_p2_kernel(x_ref, wcat_ref, wcat_blk_ref, out_ref):
    """p == 2 MXU path.

    x_ref:        (tb, n)   rows of X for this block
    wcat_ref:     (n, 2K)   [W | W*W], resident (same lane footprint as W)
    wcat_blk_ref: (tb, 2K)  [W | W*W] rows matching this X block
    """
    K = wcat_ref.shape[1] // 2

    x = x_ref[...]                                                 # (tb, n)
    # One fused MXU matmul: the same LHS pushes produce X@W and X@W2.
    xw_cat = jnp.dot(x, wcat_ref[...],
                     preferred_element_type=jnp.float32)           # (tb, 2K)
    xw = xw_cat[:, :K]                                             # X @ W
    xw2 = xw_cat[:, K:]                                            # X @ (W*W)

    w_blk = wcat_blk_ref[:, :K]                                    # (tb, K)
    w2_blk = wcat_blk_ref[:, K:]                                   # (tb, K)

    # sum_{b,c} X[b,c](W[c,k]-W[b,k])^2
    #   = sum_b (X@W2)[b,k] + rowsum(X)[b]*W2[b,k] - 2*W[b,k]*(X@W)[b,k]
    term1 = jnp.sum(xw2, axis=0, keepdims=True)                    # (1, K)
    rowsum = jnp.sum(x, axis=1, keepdims=True)                     # (tb, 1)
    term2 = jnp.sum(rowsum * w2_blk, axis=0, keepdims=True)        # (1, K)
    term3 = 2.0 * jnp.sum(w_blk * xw, axis=0, keepdims=True)       # (1, K)

    out_ref[...] = (term1 + term2 - term3).reshape(1, 1, K)


def _rgd_general_kernel(x_ref, wt_ref, wb_ref, out_ref, *, p):
    """General p, lane-dense per-k loop.

    x_ref: (tb, n) X rows; wt_ref: (K, n) = W^T (lane-dense per-k rows);
    wb_ref: (tb, K) W rows of this block.
    """
    K, n = wt_ref.shape
    x = x_ref[...]                                                 # (tb, n)
    ones_n = jnp.ones((n, 1), jnp.float32)                         # hoisted

    lane = jax.lax.broadcasted_iota(jnp.int32, (1, K), 1)
    acc = jnp.zeros((1, K), jnp.float32)
    # Static unroll over K (num_planes); fine for small K.
    # TODO(synk): move k onto a grid axis if K is ever large.
    for k in range(K):
        wk_c = wt_ref[k:k + 1, :]                                  # (1, n)  f[c,k]
        wk_b = wb_ref[:, k:k + 1]                                  # (tb, 1) f[b,k]
        diffp = _abs_pow(wk_c - wk_b, p)                           # (tb, n)
        # Reduce over c on the otherwise-idle MXU, then a tiny sublane reduce.
        nk_col = jnp.dot(x * diffp, ones_n,
                         preferred_element_type=jnp.float32)       # (tb, 1)
        nk = jnp.sum(nk_col, axis=0, keepdims=True)                # (1, 1)
        # Masked lane placement (kept for lowering robustness; negligible at
        # small K).
        acc = acc + nk * (lane == k).astype(jnp.float32)
    out_ref[...] = acc.reshape(1, 1, K)


def _pick_tb(n, max_tb=512, max_block_bytes=8 << 20):
    """Largest row tile (multiple of 8, divides n) under the byte cap,
    preferring an even grid length >= 2 so both v7x TensorCores get work."""
    assert n % 8 == 0
    cap = min(max_tb, max(8, (max_block_bytes // (4 * n)) // 8 * 8), n)
    cap = max(8, (cap // 8) * 8)
    candidates = [tb for tb in range(cap, 7, -8) if n % tb == 0]
    if not candidates:
        return 8
    for tb in candidates:                       # largest tb with even grid >= 2
        g = n // tb
        if g >= 2 and g % 2 == 0:
            return tb
    for tb in candidates:                       # else largest tb with grid >= 2
        if n // tb >= 2:
            return tb
    return candidates[0]


def _lane_padded_bytes(rows, cols, itemsize=4):
    """VMEM footprint of a 2-D f32 block after (8, 128) tile padding."""
    return itemsize * (-(-rows // 8) * 8) * (-(-cols // 128) * 128)


def _vmem_limit(est_bytes):
    cap = 48 << 20                               # safe default (v7x: 64 MiB/TC)
    try:
        phys = pltpu.get_tpu_info().vmem_capacity_bytes
        cap = int(min(phys * 0.85, 100 << 20))   # ~100 MiB v5e/v6e, ~54 MiB v7x
    except Exception:
        pass
    return int(min(max(est_bytes, 32 << 20), cap))


def model_rgd_forward(X, W, p, tb=None):
    """X: (n, n) f32, W: (n, K) f32 -> scalar f32 (same math as Model_RGD.forward)."""
    X = jnp.asarray(X, jnp.float32)
    W = jnp.asarray(W, jnp.float32)
    n, K = W.shape
    assert X.shape == (n, n), "forward requires X of shape (n, n)"
    pf = float(p)

    # Grid-invariant denominator, from the *unpadded* weight.
    denom = jnp.sum(jnp.abs(W) ** pf, axis=0)                      # (K,)

    # Zero-pad n up to a multiple of 8: padded rows/cols of X and padded rows
    # of W contribute exactly 0 to the numerator.
    n_pad = -(-n // 8) * 8
    if n_pad != n:
        X = jnp.pad(X, ((0, n_pad - n), (0, n_pad - n)))
        W = jnp.pad(W, ((0, n_pad - n), (0, 0)))

    if tb is None:
        tb = _pick_tb(n_pad)
    assert n_pad % tb == 0
    grid = (n_pad // tb,)

    out_shape = jax.ShapeDtypeStruct((n_pad // tb, 1, K), jnp.float32)
    out_spec = pl.BlockSpec((1, 1, K), lambda i: (i, 0, 0))

    cost = pl.CostEstimate(
        flops=int(4 * n_pad * n_pad * K),
        transcendentals=0 if pf.is_integer() else int(n_pad * n_pad * K),
        bytes_accessed=int(4 * (n_pad * n_pad + 4 * n_pad * K + grid[0] * K)),
    )

    if pf == 2.0:
        w_cat = jnp.concatenate([W, W * W], axis=1)                # (n_pad, 2K)
        est_vmem = (2 * _lane_padded_bytes(tb, n_pad)
                    + 2 * _lane_padded_bytes(n_pad, 2 * K)
                    + 2 * _lane_padded_bytes(tb, 2 * K)
                    + 2 * _lane_padded_bytes(8, K)
                    + (4 << 20))
        compiler_params = pltpu.CompilerParams(
            dimension_semantics=("parallel",),
            vmem_limit_bytes=_vmem_limit(est_vmem),
        )
        partials = pl.pallas_call(
            _rgd_p2_kernel,
            out_shape=out_shape,
            grid_spec=pltpu.PrefetchScalarGridSpec(
                num_scalar_prefetch=0,
                grid=grid,
                in_specs=[
                    pl.BlockSpec((tb, n_pad), lambda i: (i, 0)),      # X rows
                    pl.BlockSpec((n_pad, 2 * K), lambda i: (0, 0)),   # [W|W^2] resident
                    pl.BlockSpec((tb, 2 * K), lambda i: (i, 0)),      # [W|W^2] block rows
                ],
                out_specs=out_spec,
            ),
            compiler_params=compiler_params,
            cost_estimate=cost,
        )(X, w_cat, w_cat)
    else:
        est_vmem = (2 * _lane_padded_bytes(tb, n_pad)
                    + 2 * _lane_padded_bytes(K, n_pad)
                    + 2 * _lane_padded_bytes(tb, K)
                    + 2 * _lane_padded_bytes(8, K)
                    + (4 << 20))
        compiler_params = pltpu.CompilerParams(
            dimension_semantics=("parallel",),
            vmem_limit_bytes=_vmem_limit(est_vmem),
        )
        kernel = functools.partial(_rgd_general_kernel, p=pf)
        partials = pl.pallas_call(
            kernel,
            out_shape=out_shape,
            grid_spec=pltpu.PrefetchScalarGridSpec(
                num_scalar_prefetch=0,
                grid=grid,
                in_specs=[
                    pl.BlockSpec((tb, n_pad), lambda i: (i, 0)),   # X rows
                    pl.BlockSpec((K, n_pad), lambda i: (0, 0)),    # W^T resident
                    pl.BlockSpec((tb, K), lambda i: (i, 0)),       # W block rows
                ],
                out_specs=out_spec,
            ),
            compiler_params=compiler_params,
            cost_estimate=cost,
        )(X, W.T, W)

    # Tiny grid-invariant finalization, hoisted out of the kernel entirely.
    numer = jnp.sum(partials.reshape(-1, K), axis=0)               # (K,)
    return jnp.sum(numer / denom)


def _reference(X, W, p):
    """Pure-JAX reference of the PyTorch forward (f32 instead of f64)."""
    diffp = jnp.abs(W[None, :, :] - W[:, None, :]) ** p            # (n, n, K)
    numer = jnp.sum(X[:, :, None] * diffp, axis=(0, 1))            # (K,)
    denom = jnp.sum(jnp.abs(W) ** p, axis=0)                       # (K,)
    return jnp.sum(numer / denom)


if __name__ == "__main__":
    key = jax.random.PRNGKey(0)
    kx, kw, kx2, kw2, kx3, kw3 = jax.random.split(key, 6)

    # Small shapes consistent with the module: n=16 samples, K=4 planes.
    n, K = 16, 4
    X = jax.random.normal(kx, (n, n), dtype=jnp.float32)
    W = jax.random.normal(kw, (n, K), dtype=jnp.float32)

    # p == 2 (fused MXU path), grid length 2.
    out = jax.block_until_ready(model_rgd_forward(X, W, 2.0))
    ref = _reference(X, W, 2.0)
    assert jnp.allclose(out, ref, rtol=1e-3, atol=1e-3), (out, ref)

    # General p (per-k MXU-reduce path).
    out3 = jax.block_until_ready(model_rgd_forward(X, W, 3.0))
    ref3 = _reference(X, W, 3.0)
    assert jnp.allclose(out3, ref3, rtol=1e-3, atol=1e-3), (out3, ref3)

    # Multi-block grid with explicit tile size.
    n2 = 32
    X2 = jax.random.normal(kx2, (n2, n2), dtype=jnp.float32)
    W2 = jax.random.normal(kw2, (n2, K), dtype=jnp.float32)
    out2 = jax.block_until_ready(model_rgd_forward(X2, W2, 2.0, tb=8))
    assert jnp.allclose(out2, _reference(X2, W2, 2.0), rtol=1e-3, atol=1e-3)

    # n not a multiple of 8 -> zero-padding path, both kernels.
    n3 = 36
    X3 = jax.random.normal(kx3, (n3, n3), dtype=jnp.float32)
    W3 = jax.random.normal(kw3, (n3, K), dtype=jnp.float32)
    outp2 = jax.block_until_ready(model_rgd_forward(X3, W3, 2.0))
    assert jnp.allclose(outp2, _reference(X3, W3, 2.0), rtol=1e-3, atol=1e-3)
    outp3 = jax.block_until_ready(model_rgd_forward(X3, W3, 3.0))
    assert jnp.allclose(outp3, _reference(X3, W3, 3.0), rtol=1e-3, atol=1e-3)

    print("KERNEL_OK")
</pallas_src>

<mosaic_0001>
module attributes {stable_mosaic.version = 11 : i64} {
  func.func @_rgd_p2_kernel(%arg0: i32, %arg1: memref<8x16xf32, #tpu.memory_space<vmem>>, %arg2: memref<16x8xf32, #tpu.memory_space<vmem>>, %arg3: memref<8x8xf32, #tpu.memory_space<vmem>>, %arg4: memref<1x1x4xf32, #tpu.memory_space<vmem>>) attributes {dimension_semantics = [#tpu.dimension_semantics<parallel>], iteration_bounds = array<i64: 2>, scalar_prefetch = 0 : i64, scratch_operands = 0 : i64, tpu.core_type = #tpu.core_type<tc>, window_params = [{transform_indices = @transform_0, window_bounds = array<i64: 8, 16>}, {pipeline_mode = #tpu.pipeline_mode<synchronous>, transform_indices = @transform_1, window_bounds = array<i64: 16, 8>}, {transform_indices = @transform_2, window_bounds = array<i64: 8, 8>}, {transform_indices = @transform_3, window_bounds = array<i64: 1, 1, 4>}]} {
    %c0 = arith.constant 0 : index
    %c0_0 = arith.constant 0 : index
    %0 = vector.load %arg1[%c0, %c0_0] : memref<8x16xf32, #tpu.memory_space<vmem>>, vector<8x16xf32>
    %c0_1 = arith.constant 0 : index
    %c0_2 = arith.constant 0 : index
    %1 = vector.load %arg2[%c0_1, %c0_2] : memref<16x8xf32, #tpu.memory_space<vmem>>, vector<16x8xf32>
    %cst = arith.constant dense<0.000000e+00> : vector<8x8xf32>
    %2 = tpu.matmul %0, %1, %cst {dimension_numbers = #tpu.dot_dimension_numbers<[1], [0], [0], [1], [0, 0, 1, 1], [], []>} : vector<8x16xf32>, vector<16x8xf32>, vector<8x8xf32> -> vector<8x8xf32>
    %3 = vector.extract_strided_slice %2 {offsets = [0, 0], sizes = [8, 4], strides = [1, 1]} : vector<8x8xf32> to vector<8x4xf32>
    %4 = vector.extract_strided_slice %2 {offsets = [0, 4], sizes = [8, 4], strides = [1, 1]} : vector<8x8xf32> to vector<8x4xf32>
    %c0_3 = arith.constant 0 : index
    %c0_4 = arith.constant 0 : index
    %5 = vector.load %arg3[%c0_3, %c0_4] : memref<8x8xf32, #tpu.memory_space<vmem>>, vector<8x4xf32>
    %c0_5 = arith.constant 0 : index
    %c4 = arith.constant 4 : index
    %6 = vector.load %arg3[%c0_5, %c4] : memref<8x8xf32, #tpu.memory_space<vmem>>, vector<8x4xf32>
    %cst_6 = arith.constant dense<0.000000e+00> : vector<4xf32>
    %7 = vector.multi_reduction <add>, %4, %cst_6 [0] : vector<8x4xf32> to vector<4xf32>
    %8 = vector.shape_cast %7 : vector<4xf32> to vector<1x4xf32>
    %cst_7 = arith.constant dense<0.000000e+00> : vector<8xf32>
    %9 = vector.multi_reduction <add>, %0, %cst_7 [1] : vector<8x16xf32> to vector<8xf32>
    %10 = vector.shape_cast %9 : vector<8xf32> to vector<8x1xf32>
    %11 = vector.broadcast %10 : vector<8x1xf32> to vector<8x4xf32>
    %12 = arith.mulf %11, %6 : vector<8x4xf32>
    %cst_8 = arith.constant dense<0.000000e+00> : vector<4xf32>
    %13 = vector.multi_reduction <add>, %12, %cst_8 [0] : vector<8x4xf32> to vector<4xf32>
    %14 = vector.shape_cast %13 : vector<4xf32> to vector<1x4xf32>
    %15 = arith.mulf %5, %3 : vector<8x4xf32>
    %cst_9 = arith.constant dense<0.000000e+00> : vector<4xf32>
    %16 = vector.multi_reduction <add>, %15, %cst_9 [0] : vector<8x4xf32> to vector<4xf32>
    %17 = vector.shape_cast %16 : vector<4xf32> to vector<1x4xf32>
    %cst_10 = arith.constant 2.000000e+00 : f32
    %18 = vector.broadcast %cst_10 : f32 to vector<1x4xf32>
    %19 = arith.mulf %18, %17 : vector<1x4xf32>
    %20 = arith.addf %8, %14 : vector<1x4xf32>
    %21 = arith.subf %20, %19 : vector<1x4xf32>
    %22 = vector.shape_cast %21 : vector<1x4xf32> to vector<1x1x4xf32>
    %c0_11 = arith.constant 0 : index
    %c0_12 = arith.constant 0 : index
    %c0_13 = arith.constant 0 : index
    %23 = vector.load %arg4[%c0_11, %c0_12, %c0_13] : memref<1x1x4xf32, #tpu.memory_space<vmem>>, vector<1x1x4xf32>
    tpu.vector_store %arg4[%c0_11, %c0_12, %c0_13], %22 {strides = array<i32>} : memref<1x1x4xf32, #tpu.memory_space<vmem>>, vector<1x1x4xf32>,
    return
  }
  func.func @transform_0(%arg0: i32) -> (i32, i32) {
    %c0_i32 = arith.constant 0 : i32
    %c0_i32_0 = arith.constant 0 : i32
    return %arg0, %c0_i32 : i32, i32
  }
  func.func @transform_1(%arg0: i32) -> (i32, i32) {
    %c0_i32 = arith.constant 0 : i32
    %c0_i32_0 = arith.constant 0 : i32
    %c0_i32_1 = arith.constant 0 : i32
    return %c0_i32, %c0_i32_0 : i32, i32
  }
  func.func @transform_2(%arg0: i32) -> (i32, i32) {
    %c0_i32 = arith.constant 0 : i32
    %c0_i32_0 = arith.constant 0 : i32
    return %arg0, %c0_i32 : i32, i32
  }
  func.func @transform_3(%arg0: i32) -> (i32, i32, i32) {
    %c0_i32 = arith.constant 0 : i32
    %c0_i32_0 = arith.constant 0 : i32
    %c0_i32_1 = arith.constant 0 : i32
    return %arg0, %c0_i32, %c0_i32_0 : i32, i32, i32
  }
}

</mosaic_0001>

<bundles_post_ra>
// kernel: tpu_custom_call.1
= control target key start
LH: loop header
LB: loop body
LE: loop exit
PB: predicated region body
PF: predicated region fallthrough
CT: control target
= control target key end

     0   :  { %8 = vsyncpa [#allocation3], 0  ;;  %s647_s0 = inlined_call_operand.vmem [shape: f32[16,16], index: 0, kind: input, shape index: {}]   ;;  %s648_s1 = inlined_call_operand.vmem [shape: f32[16,8], index: 1, kind: input, shape index: {}]   ;;  %s649_s2 = inlined_call_operand.vmem [shape: f32[16,8], index: 2, kind: input, shape index: {}]   ;;  %s650_s3 = inlined_call_operand.hbm [shape: f32[2,1,4], index: 3, kind: output, shape index: {}]  }
   0x1   :  { %10 = vsyncpa [#allocation3 + $0x1], 0  ;;  %s538_s12 = smov 0   ;;  %s540_s13 = smov 0  }
   0x2   :  { %s542_s14 = smov 0   ;;  %s544_s15 = smov 0  }
   0x3 LB: > { %s559_s16 = sadd.s32 4294967295, %s510_s15   ;;  %s381_s17 = sadd.s32 4294967294, %s510_s15   ;;  %s510_s15 = sphi %s544_s15, %s656_s15   ;;  %s506_s14 = sphi %s542_s14, %s655_s14   ;;  %s502_s13 = sphi %s540_s13, %s654_s13   ;;  %s498_s12 = sphi %s538_s12, %s653_s12  }
   0x4   : > { %s563_s18 = sadd.s32 1, %s510_s15   ;;  %s96_s19 = sadd.s32 1, %s506_s14 }
   0x5   : > { %s93_s20 = ssub.s32 %s510_s15, %s563_s18  ;;  %p106_p0 = scmp.ne.s32.totalorder %s506_s14, %s502_s13 }
   0x6   : > { %p94_p1 = scmp.eq.s32.totalorder %s93_s20, 0  ;;  %p107_p2 = scmp.eq.s32.totalorder %s559_s16, 1 }
   0x7   : > { %p112_p3 = scmp.ne.s32.totalorder %s502_s13, %s498_s12  ;;  %p113_p4 = scmp.eq.s32.totalorder %s381_s17, 1 }
   0x8   : > { %s574_s21 = scalar_select %p94_p1, %s506_s14, %s96_s19  }
   0x9   : > { %p576_p5 = por %p107_p2, %p106_p0  ;;  %p580_p6 = por %p113_p4, %p112_p3 }
   0xa   : > { %p384_p7 = scmp.ge.s32.totalorder %s510_s15, 1  ;;  %p148_p8 = scmp.lt.s32.totalorder %s510_s15, 3 }
   0xc   : > { %p149_p9 = pnand %p384_p7, %p148_p8 }
   0xd   : > { %v183_v0 = vld [vmem:[%s648_s1] sm:$0xff] (!%p149_p9)  ;;  %v184_v1 = vld [vmem:[%s648_s1 + $0x8] sm:$0xff] (!%p149_p9)  ;;  %p174_p10 = scmp.lt.s32.totalorder (!%p149_p9), %s559_s16, 1  ;;  %v512_v2 = vmov (!%p149_p9), 0.0|0.0   ;;  %vm513_vm0 = vmmov (!%p149_p9), 0   ;;  %v514_v4 = vmov (!%p149_p9), 0.0  }
   0xe   : > { %152 = sbr.rel (%p149_p9) target bundleno = 501 (0x1f5), region = 32  ;;  %401 = vmatprep.subr.bf16.mxu0 (!%p149_p9), %v512_v2  ;;  %v402_v3 = vpack.c.bf16 (!%p149_p9), %v184_v1, %v183_v0  ;;  %398 = vmatprep.mubr.msk.f32.mxu0 (!%p149_p9), %vm513_vm0, %v514_v4  ;;  %vm185_vm1 = vcmask (!%p149_p9), 130048   ;;  %vm280_vm2 = vcmask (!%p149_p9), 31744   ;;  %s515_s9 = smov (!%p149_p9), 4   ;;  %vm260_vm3 = vcmask (!%p149_p9), 64544  }
   0xf   : > { %s516_s10 = smov (!%p149_p9), 124   ;;  %s172_s11 = sand.u32 (!%p149_p9), 1, %s502_s13   ;;  %vm299_vm4 = vcmask (!%p149_p9), 24576  }
  0x10   : > { %403 = vmatpush3.bf16.msra.mxu0 (!%p149_p9), %v402_v3  ;;  %s388_s17 = sshll.u32 (!%p149_p9), %s559_s16, 4  ;;  %s173_s19 = scalar_lea.vmem (!%p149_p9), [#allocation2], %s172_s11 }
  0x11   : > { %s314_s20 = sshll.u32 (!%p149_p9), %s173_s19, 4  ;;  %s605_s26 = scalar_lea.hbm (!%p149_p9), %s650_s3, %s388_s17  ;;  %s607_s20 = int_to_ptr.vmem [resolvable:$true] %s314_s20 }
  0x12   : > { %s302_s27 = scalar_lea.sflag (!%p149_p9), [#allocation3], %s172_s11 }
  0x15   : > { %s175_s28 = scalar_select %p174_p10, %s559_s16, 1 }
  0x16   : > { %s517_s16 = smov [#allocation2]  }
  0x17   : > { %s385_s29 = sshll.u32 %s175_s28, 3  ;;  %s448_s28 = scalar_lea.vmem %s607_s20, 16 }
  0x18   : > { %s177_s5 = scalar_lea.vmem %s647_s0, %s385_s29  ;;  %s181_s8 = scalar_lea.vmem %s649_s2, %s385_s29 }
  0x19   : > { %v182_v5 = vld [vmem:[%s177_s5] sm:$0xff]  ;;  %p449_p11 = scmp.ne.s32.totalorder %s607_s20, %s448_s28  ;;  %s452_s29 = sshll.u32 %s517_s16, 4  ;;  %s453_s29 = int_to_ptr.vmem [resolvable:$false] %s452_s29 }
  0x1a   : > { %399 = vmatmul.mubr.msk.f32.vlgmr.msra.gmra.mrb[0].mxu0 %vm185_vm1, %v182_v5  ;;  %v268_v6 = vsel %vm185_vm1, %v182_v5, 0.0  ;;  %v259_v7 = vld [vmem:[%s181_s8] sm:$0xff]  ;;  %s454_s30 = scalar_lea.vmem %s453_s29, 32  ;;  %p455_p0 = scmp.lt.s32.totalorder %s607_s20, %s453_s29 }
  0x1b   : > { %269 = vadd.xlane.f32.xlu0 %v268_v6  ;;  %p450_p12 = pnand %p449_p11, %p576_p5  ;;  %p456_p1 = scmp.lt.s32.totalorder %s454_s30, %s448_s28 }
  0x1d   : > { %p451_p13 = pneg %p450_p12  ;;  %p457_p2 = por %p456_p1, %p455_p0 }
  0x1f   : > { %p458_p3 = pnand %p457_p2, %p451_p13 }
  0xa8   : > { %v270_v19 = vpop.xlane.xlu0 %269 }
  0xa9   : > { %v271_v20 = vmul.f32 %v270_v19, %v259_v7 }
  0xab   : > { %v272_v21 = vsel %vm260_vm3, %v271_v20, 0.0 }
  0xac   : > { %v273_v23 = vrot.slane %v272_v21, 4 }
  0xae   : > { %v274_v25 = vadd.f32 %v273_v23, %v272_v21 }
  0xb0   : > { %v275_v27 = vrot.slane %v274_v25, 2 }
  0xb2   : > { %v276_v29 = vadd.f32 %v275_v27, %v274_v25 }
  0xb4   : > { %v277_v31 = vrot.slane %v276_v29, 1 }
  0xb6   : > { %v278_v33 = vadd.f32 %v277_v31, %v276_v29 }
  0xed   : > { %v255_v8 = vpop.f32.mrb[0].mxu0 }
  0xee   : > { %v279_v9 = vmul.f32 %v259_v7, %v255_v8  ;;  %v400_v10 = vpop.f32.mrb[1].mxu0  ;;  %v261_v22 = vsel %vm260_vm3, %v255_v8, 0.0 }
  0xef   : > { %v262_v24 = vrot.slane %v261_v22, 4 }
  0xf0   : > { %v281_v11 = vsel %vm280_vm2, %v279_v9, 0.0 }
  0xf1   : > { %v282_v12 = vrot.slane %v281_v11, 4  ;;  %v263_v26 = vadd.f32 %v262_v24, %v261_v22 }
  0xf3   : > { %v283_v13 = vadd.f32 %v282_v12, %v281_v11  ;;  %v264_v28 = vrot.slane %v263_v26, 2 }
  0xf5   : > { %v284_v14 = vrot.slane %v283_v13, 2  ;;  %v265_v30 = vadd.f32 %v264_v28, %v263_v26 }
  0xf7   : > { %v285_v15 = vadd.f32 %v284_v14, %v283_v13  ;;  %v266_v32 = vrot.slane %v265_v30, 1 }
  0xf9   : > { %v286_v16 = vrot.slane %v285_v15, 1  ;;  %v267_v34 = vadd.f32 %v266_v32, %v265_v30 }
  0xfb   : > { %v287_v17 = vadd.f32 %v286_v16, %v285_v15  ;;  %v289_v35 = vadd.f32 %v278_v33, %v267_v34 }
  0xfd   : > { %v288_v18 = vmul.f32 2.0, %v287_v17 }
  0xff   : > { %291 = vrot.lane.b32.xlu0 %v288_v18, %s515_s9 }
 0x171   : > { %v292_v36 = vpop.permute.xlu0 %291 }
 0x172   : > { %v294_v37 = vsub.f32 %v289_v35, %v292_v36 }
 0x174   : > { %296 = vrot.lane.b32.xlu1 %v294_v37, %s516_s10 }
 0x1e6   : > { %v297_v38 = vpop.permute.xlu1 %296 }
 0x1e7   : > { %300 = vst.msk [vmem:[%s173_s19] sm:$0x1] %vm299_vm4, %v297_v38 }
 0x1e8   : > { %461 = shalt.err (!%p458_p3)
}
 0x1e9   : > { %s462_s4 = scalar_lea.hbm %s605_s26, 16  ;;  %s466_s7 = scalar_lea.hbm %s650_s3, 32 }
 0x1ea   : > { %p463_p4 = scmp.ne.s32.totalorder %s605_s26, %s462_s4  ;;  %p467_p9 = scmp.lt.u32.totalorder %s605_s26, %s650_s3 }
 0x1eb   : > { %p468_p10 = scmp.lt.u32.totalorder %s466_s7, %s462_s4  ;;  %p470_p12 = scmp.lt.u32.totalorder %s462_s4, %s605_s26 }
 0x1ec   : > { %p464_p7 = pnand %p463_p4, %p576_p5 }
 0x1ed   : > { %p469_p11 = por %p468_p10, %p467_p9 }
 0x1ee   : > { %p465_p8 = pneg %p464_p7 }
 0x1ef   : > { %p471_p13 = por %p470_p12, %p469_p11 }
 0x1f1   : > { %p472_p0 = pnand %p471_p13, %p465_p8 }
 0x1f3   : > { %475 = shalt.err (!%p472_p0)
}
 0x1f4   : > { %404 = dma.vmem_to_hbm [thread:$0]  (%p576_p5), %s607_s20, 16, %s605_s26, %s302_s27  }
 0x1f5 PF: > { %p410_p1 = scmp.ge.s32.totalorder %s510_s15, 2  ;;  %s326_s10 = sand.u32 1, %s498_s12  }
 0x1f6   : > { %s327_s11 = scalar_lea.sflag [#allocation3], %s326_s10 }
 0x1f7   : > { %p407_p2 = pnand %p410_p1, %p580_p6 }
 0x1f9   : > { %493 = dma.done.wait (!%p407_p2), %s327_s11, 16  }
 0x1fa   : > { %495 = vsyncadd (!%p407_p2), %s327_s11, 4294967280  ;;  %p13_p3 = scmp.ge.s32.totalorder %s563_s18, 4   ;;  %s653_s12 = smov %s502_s13 }
 0x1fb   : > { %s654_s13 = smov %s506_s14  ;;  %s655_s14 = smov %s574_s21 }
 0x1fc   : > { %s656_s15 = smov %s563_s18  ;;  %15 = sbr.rel (!%p13_p3) target bundleno = 3 (0x3), region = 70 }
 0x203   :  { %331 = vsyncpa [#allocation3], 1 }
 0x204   :  { %333 = vsyncpa [#allocation3 + $0x1], 1 }

</bundles_post_ra>
